<compile_context>
chip_gen: v7x
topology: tpu7x:2x2x1
jax: 0.10.0
libtpu: 0.0.40
codegen_flags: <defaults>
</compile_context>

<pallas_src>
import jax
import jax.numpy as jnp
from jax.experimental import pallas as pl
from jax.experimental.pallas import tpu as pltpu


def _round_up(n, m):
    return (n + m - 1) // m * m


def _meta_learner_kernel(x1_ref, x2_ref, w1a_ref, w1b_ref, b1_ref, w2_ref,
                         b2_ref, o_ref):
    # x1_ref, x2_ref: [TB, E]      batch tile of each input half
    # w1a_ref:        [E, E]       w1[:, :E].T  (resident across the grid)
    # w1b_ref:        [E, E]       w1[:, E:].T  (resident across the grid)
    # b1_ref:         [1, E]
    # w2_ref:         [1, E]
    # b2_ref:         [1]          SMEM scalar
    # o_ref:          [TB, 1]
    h = jnp.dot(x1_ref[...], w1a_ref[...], preferred_element_type=jnp.float32)
    h = h + jnp.dot(x2_ref[...], w1b_ref[...],
                    preferred_element_type=jnp.float32)
    h = jnp.maximum(h + b1_ref[...], 0.0)                       # ReLU (VPU)
    # Second linear layer (out_dim == 1): VPU multiply + XLU lane reduce
    # instead of a degenerate [E, 1] MXU matmul.
    y = jnp.sum(h * w2_ref[...], axis=-1, keepdims=True) + b2_ref[0]
    o_ref[...] = y.astype(o_ref.dtype)


def prepare_params(params):
    """One-time re-layout of PyTorch-style params for the kernel.

    params: 'ml_fc_w1' [E, 2E], 'ml_fc_b1' [E], 'ml_fc_w2' [1, E], 'ml_fc_b2' [1]
    Call this once (not per forward) so the weight transpose / split is not an
    extra per-call HBM copy.
    """
    e = params["ml_fc_b1"].shape[0]
    w1 = params["ml_fc_w1"]                                   # [E, 2E]
    return {
        "w1a_t": jnp.asarray(w1[:, :e].T, jnp.float32),       # [E, E]
        "w1b_t": jnp.asarray(w1[:, e:].T, jnp.float32),       # [E, E]
        "b1": params["ml_fc_b1"].reshape(1, e).astype(jnp.float32),
        "w2": params["ml_fc_w2"].reshape(1, e).astype(jnp.float32),
        "b2": params["ml_fc_b2"].reshape(1).astype(jnp.float32),
    }


def meta_learner_forward(x1, x2, prep):
    """Pallas-backed forward pass.

    x1, x2: [B, E] float32
    prep:   output of prepare_params()
    returns [B, 1] float32
    """
    B, E = x1.shape
    assert x2.shape == (B, E)

    # Batch tile: multiple of 8 sublanes, capped so (2 inputs + out) x 2
    # buffers + the two resident [E, E] weight halves stay well inside the
    # scoped VMEM limit on every generation (incl. v7x's smaller VMEM).
    TB = min(_round_up(B, 8), 512)
    B_pad = _round_up(B, TB)
    if B_pad != B:
        pad = ((0, B_pad - B), (0, 0))
        x1 = jnp.pad(x1, pad)
        x2 = jnp.pad(x2, pad)

    grid = (B_pad // TB,)
    batch_spec = pl.BlockSpec((TB, E), lambda i: (i, 0))
    resident = lambda a: pl.BlockSpec(a.shape, lambda i: (0,) * a.ndim)

    out = pl.pallas_call(
        _meta_learner_kernel,
        out_shape=jax.ShapeDtypeStruct((B_pad, 1), jnp.float32),
        grid=grid,
        in_specs=[
            batch_spec,                      # x1 tile
            batch_spec,                      # x2 tile
            resident(prep["w1a_t"]),         # weights stay VMEM-resident
            resident(prep["w1b_t"]),
            resident(prep["b1"]),
            resident(prep["w2"]),
            pl.BlockSpec(memory_space=pltpu.MemorySpace.SMEM),  # b2 scalar
        ],
        out_specs=pl.BlockSpec((TB, 1), lambda i: (i, 0)),
        compiler_params=pltpu.CompilerParams(
            dimension_semantics=("parallel",)),
    )(x1, x2, prep["w1a_t"], prep["w1b_t"], prep["b1"], prep["w2"], prep["b2"])

    return out[:B]


def init_params(key, embedding_dim):
    """Deterministic xavier-normal init matching the PyTorch __init__ shapes."""
    fc1_in = embedding_dim * 2
    fc2_in = embedding_dim
    fc2_out = 1
    k1, k2 = jax.random.split(key)

    def xavier_normal(k, shape):
        fan_out, fan_in = shape
        std = (2.0 / (fan_in + fan_out)) ** 0.5
        return std * jax.random.normal(k, shape, dtype=jnp.float32)

    return {
        "ml_fc_w1": xavier_normal(k1, (fc2_in, fc1_in)),   # [E, 2E]
        "ml_fc_b1": jnp.zeros((fc2_in,), jnp.float32),     # [E]
        "ml_fc_w2": xavier_normal(k2, (fc2_out, fc2_in)),  # [1, E]
        "ml_fc_b2": jnp.zeros((fc2_out,), jnp.float32),    # [1]
    }


def _reference_forward(x1, x2, params):
    x = jnp.concatenate([x1, x2], axis=1)
    h = jnp.maximum(x @ params["ml_fc_w1"].T + params["ml_fc_b1"], 0.0)
    return h @ params["ml_fc_w2"].T + params["ml_fc_b2"]


def _check(batch, embedding_dim, seed):
    key = jax.random.PRNGKey(seed)
    kp, kx1, kx2 = jax.random.split(key, 3)
    params = init_params(kp, embedding_dim)
    prep = prepare_params(params)
    x1 = jax.random.normal(kx1, (batch, embedding_dim), dtype=jnp.float32)
    x2 = jax.random.normal(kx2, (batch, embedding_dim), dtype=jnp.float32)

    out = jax.block_until_ready(meta_learner_forward(x1, x2, prep))
    ref = _reference_forward(x1, x2, params)

    assert out.shape == (batch, 1), out.shape
    assert jnp.allclose(out, ref, atol=2e-5, rtol=1e-5), (
        f"mismatch vs JAX reference (B={batch}, E={embedding_dim})")


if __name__ == "__main__":
    # Small config matching the module (single grid step, no padding).
    _check(batch=8, embedding_dim=32, seed=0)
    # Larger batch: exercises the batch grid (>1 step), padding and the
    # "parallel" megacore axis.
    _check(batch=600, embedding_dim=64, seed=1)

    print("KERNEL_OK")
</pallas_src>

<mosaic_0001>
module attributes {stable_mosaic.version = 11 : i64} {
  func.func @_meta_learner_kernel(%arg0: i32, %arg1: memref<8x32xf32, #tpu.memory_space<vmem>>, %arg2: memref<8x32xf32, #tpu.memory_space<vmem>>, %arg3: memref<32x32xf32, #tpu.memory_space<vmem>>, %arg4: memref<32x32xf32, #tpu.memory_space<vmem>>, %arg5: memref<1x32xf32, #tpu.memory_space<vmem>>, %arg6: memref<1x32xf32, #tpu.memory_space<vmem>>, %arg7: memref<1xf32, #tpu.memory_space<smem>>, %arg8: memref<8x1xf32, #tpu.memory_space<vmem>>) attributes {dimension_semantics = [#tpu.dimension_semantics<parallel>], iteration_bounds = array<i64: 1>, scalar_prefetch = 0 : i64, scratch_operands = 0 : i64, tpu.core_type = #tpu.core_type<tc>, window_params = [{transform_indices = @transform_0, window_bounds = array<i64: 8, 32>}, {transform_indices = @transform_1, window_bounds = array<i64: 8, 32>}, {pipeline_mode = #tpu.pipeline_mode<synchronous>, transform_indices = @transform_2, window_bounds = array<i64: 32, 32>}, {pipeline_mode = #tpu.pipeline_mode<synchronous>, transform_indices = @transform_3, window_bounds = array<i64: 32, 32>}, {pipeline_mode = #tpu.pipeline_mode<synchronous>, transform_indices = @transform_4, window_bounds = array<i64: 1, 32>}, {pipeline_mode = #tpu.pipeline_mode<synchronous>, transform_indices = @transform_5, window_bounds = array<i64: 1, 32>}, {transform_indices = @transform_6, window_bounds = array<i64: 1>}, {transform_indices = @transform_7, window_bounds = array<i64: 8, 1>}]} {
    %c0 = arith.constant 0 : index
    %c0_0 = arith.constant 0 : index
    %0 = vector.load %arg1[%c0, %c0_0] : memref<8x32xf32, #tpu.memory_space<vmem>>, vector<8x32xf32>
    %c0_1 = arith.constant 0 : index
    %c0_2 = arith.constant 0 : index
    %1 = vector.load %arg3[%c0_1, %c0_2] : memref<32x32xf32, #tpu.memory_space<vmem>>, vector<32x32xf32>
    %cst = arith.constant dense<0.000000e+00> : vector<8x32xf32>
    %2 = tpu.matmul %0, %1, %cst {dimension_numbers = #tpu.dot_dimension_numbers<[1], [0], [0], [1], [0, 0, 1, 1], [], []>} : vector<8x32xf32>, vector<32x32xf32>, vector<8x32xf32> -> vector<8x32xf32>
    %c0_3 = arith.constant 0 : index
    %c0_4 = arith.constant 0 : index
    %3 = vector.load %arg2[%c0_3, %c0_4] : memref<8x32xf32, #tpu.memory_space<vmem>>, vector<8x32xf32>
    %c0_5 = arith.constant 0 : index
    %c0_6 = arith.constant 0 : index
    %4 = vector.load %arg4[%c0_5, %c0_6] : memref<32x32xf32, #tpu.memory_space<vmem>>, vector<32x32xf32>
    %cst_7 = arith.constant dense<0.000000e+00> : vector<8x32xf32>
    %5 = tpu.matmul %3, %4, %cst_7 {dimension_numbers = #tpu.dot_dimension_numbers<[1], [0], [0], [1], [0, 0, 1, 1], [], []>} : vector<8x32xf32>, vector<32x32xf32>, vector<8x32xf32> -> vector<8x32xf32>
    %6 = arith.addf %2, %5 : vector<8x32xf32>
    %c0_8 = arith.constant 0 : index
    %c0_9 = arith.constant 0 : index
    %7 = vector.load %arg5[%c0_8, %c0_9] : memref<1x32xf32, #tpu.memory_space<vmem>>, vector<1x32xf32>
    %8 = vector.broadcast %7 : vector<1x32xf32> to vector<8x32xf32>
    %9 = arith.addf %6, %8 : vector<8x32xf32>
    %cst_10 = arith.constant 0.000000e+00 : f32
    %10 = vector.broadcast %cst_10 : f32 to vector<8x32xf32>
    %11 = arith.maximumf %9, %10 : vector<8x32xf32>
    %c0_11 = arith.constant 0 : index
    %c0_12 = arith.constant 0 : index
    %12 = vector.load %arg6[%c0_11, %c0_12] : memref<1x32xf32, #tpu.memory_space<vmem>>, vector<1x32xf32>
    %13 = vector.broadcast %12 : vector<1x32xf32> to vector<8x32xf32>
    %14 = arith.mulf %11, %13 : vector<8x32xf32>
    %cst_13 = arith.constant dense<0.000000e+00> : vector<8xf32>
    %15 = vector.multi_reduction <add>, %14, %cst_13 [1] : vector<8x32xf32> to vector<8xf32>
    %16 = vector.shape_cast %15 : vector<8xf32> to vector<8x1xf32>
    %c0_14 = arith.constant 0 : index
    %17 = memref.load %arg7[%c0_14] : memref<1xf32, #tpu.memory_space<smem>>
    %18 = vector.broadcast %17 : f32 to vector<8x1xf32>
    %19 = arith.addf %16, %18 : vector<8x1xf32>
    %c0_15 = arith.constant 0 : index
    %c0_16 = arith.constant 0 : index
    %20 = vector.load %arg8[%c0_15, %c0_16] : memref<8x1xf32, #tpu.memory_space<vmem>>, vector<8x1xf32>
    tpu.vector_store %arg8[%c0_15, %c0_16], %19 {strides = array<i32>} : memref<8x1xf32, #tpu.memory_space<vmem>>, vector<8x1xf32>,
    return
  }
  func.func @transform_0(%arg0: i32) -> (i32, i32) {
    %c0_i32 = arith.constant 0 : i32
    %c0_i32_0 = arith.constant 0 : i32
    return %arg0, %c0_i32 : i32, i32
  }
  func.func @transform_1(%arg0: i32) -> (i32, i32) {
    %c0_i32 = arith.constant 0 : i32
    %c0_i32_0 = arith.constant 0 : i32
    return %arg0, %c0_i32 : i32, i32
  }
  func.func @transform_2(%arg0: i32) -> (i32, i32) {
    %c0_i32 = arith.constant 0 : i32
    %c0_i32_0 = arith.constant 0 : i32
    %c0_i32_1 = arith.constant 0 : i32
    return %c0_i32, %c0_i32_0 : i32, i32
  }
  func.func @transform_3(%arg0: i32) -> (i32, i32) {
    %c0_i32 = arith.constant 0 : i32
    %c0_i32_0 = arith.constant 0 : i32
    %c0_i32_1 = arith.constant 0 : i32
    return %c0_i32, %c0_i32_0 : i32, i32
  }
  func.func @transform_4(%arg0: i32) -> (i32, i32) {
    %c0_i32 = arith.constant 0 : i32
    %c0_i32_0 = arith.constant 0 : i32
    %c0_i32_1 = arith.constant 0 : i32
    return %c0_i32, %c0_i32_0 : i32, i32
  }
  func.func @transform_5(%arg0: i32) -> (i32, i32) {
    %c0_i32 = arith.constant 0 : i32
    %c0_i32_0 = arith.constant 0 : i32
    %c0_i32_1 = arith.constant 0 : i32
    return %c0_i32, %c0_i32_0 : i32, i32
  }
  func.func @transform_6(%arg0: i32) -> i32 {
    %c0_i32 = arith.constant 0 : i32
    %c0_i32_0 = arith.constant 0 : i32
    return %c0_i32 : i32
  }
  func.func @transform_7(%arg0: i32) -> (i32, i32) {
    %c0_i32 = arith.constant 0 : i32
    %c0_i32_0 = arith.constant 0 : i32
    return %arg0, %c0_i32 : i32, i32
  }
}

</mosaic_0001>

<bundles_post_ra>
// kernel: tpu_custom_call.1
= control target key start
LH: loop header
LB: loop body
LE: loop exit
PB: predicated region body
PF: predicated region fallthrough
CT: control target
= control target key end

     0   :  { %13 = vsyncpa [#allocation4], 0  ;;  %s527_s0 = inlined_call_operand.hbm [shape: f32[8,32], index: 0, kind: input, shape index: {}]   ;;  %s528_s1 = inlined_call_operand.hbm [shape: f32[8,32], index: 1, kind: input, shape index: {}]   ;;  %s529_s2 = inlined_call_operand.hbm [shape: f32[32,32], index: 2, kind: input, shape index: {}]   ;;  %s530_s3 = inlined_call_operand.hbm [shape: f32[32,32], index: 3, kind: input, shape index: {}]   ;;  %s531_s4 = inlined_call_operand.vmem [shape: f32[1,32], index: 4, kind: input, shape index: {}]   ;;  %s532_s5 = inlined_call_operand.vmem [shape: f32[1,32], index: 5, kind: input, shape index: {}]   ;;  %s533_s6 = inlined_call_operand.<no memory space> [shape: f32[1], index: 6, kind: input, shape index: {}]   ;;  %s534_s7 = inlined_call_operand.vmem [shape: f32[8,1], index: 7, kind: output, shape index: {}]  }
   0x1   :  { %14 = vsyncpa [#allocation6], 0 }
   0x2   :  { %15 = vsyncpa [#allocation9], 0  ;;  %s418_s24 = smov [#allocation5]   ;;  %s419_s26 = smov [#allocation3]  }
   0x3   :  { %s32_s25 = sshll.u32 %s418_s24, 4  ;;  %s22_s27 = sshll.u32 %s419_s26, 4  ;;  %s33_s25 = int_to_ptr.vmem [resolvable:$true] %s32_s25  ;;  %s23_s27 = int_to_ptr.vmem [resolvable:$true] %s22_s27 }
   0x4   :  { %s324_s30 = scalar_lea.hbm %s528_s1, 128 }
   0x5   :  { %p325_p0 = scmp.ne.s32.totalorder %s528_s1, %s324_s30  ;;  %p328_p1 = scmp.lt.u32.totalorder %s324_s30, %s528_s1 }
   0x7   :  { %p330_p2 = pnand %p328_p1, %p325_p0 }
   0x9   :  { %333 = shalt.err (!%p330_p2)
}
   0xa   :  { %s334_s12 = scalar_lea.vmem %s33_s25, 128  ;;  %p339_p4 = scmp.lt.s32.totalorder %s33_s25, %s33_s25 }
   0xb   :  { %p335_p3 = scmp.ne.s32.totalorder %s33_s25, %s334_s12  ;;  %p340_p5 = scmp.lt.s32.totalorder %s334_s12, %s334_s12 }
   0xd   :  { %p341_p6 = por %p340_p5, %p339_p4 }
   0xf   :  { %p342_p7 = pnand %p341_p6, %p335_p3 }
  0x11   :  { %345 = shalt.err (!%p342_p7)
}
  0x12   :  { %35 = dma.hbm_to_vmem [thread:$0]  %s528_s1, 128, %s33_s25, [#allocation6]  }
  0x13   :  { %s346_s17 = scalar_lea.hbm %s527_s0, 128 }
  0x14   :  { %p347_p8 = scmp.ne.s32.totalorder %s527_s0, %s346_s17  ;;  %p350_p9 = scmp.lt.u32.totalorder %s346_s17, %s527_s0 }
  0x16   :  { %p352_p10 = pnand %p350_p9, %p347_p8 }
  0x18   :  { %355 = shalt.err (!%p352_p10)
}
  0x19   :  { %s356_s22 = scalar_lea.vmem %s23_s27, 128  ;;  %p361_p12 = scmp.lt.s32.totalorder %s23_s27, %s23_s27 }
  0x1a   :  { %p357_p11 = scmp.ne.s32.totalorder %s23_s27, %s356_s22  ;;  %p362_p13 = scmp.lt.s32.totalorder %s356_s22, %s356_s22 }
  0x1c   :  { %p363_p0 = por %p362_p13, %p361_p12 }
  0x1e   :  { %p364_p1 = pnand %p363_p0, %p357_p11 }
  0x20   :  { %367 = shalt.err (!%p364_p1)
}
  0x21   :  { %25 = dma.hbm_to_vmem [thread:$0]  %s527_s0, 128, %s23_s27, [#allocation4]  }
  0x22   :  { %s420_s24 = smov [#allocation7]   ;;  %s368_s29 = scalar_lea.hbm %s529_s2, 512 }
  0x23   :  { %s41_s25 = sshll.u32 %s420_s24, 4  ;;  %p369_p2 = scmp.ne.s32.totalorder %s529_s2, %s368_s29  ;;  %s42_s25 = int_to_ptr.vmem [resolvable:$true] %s41_s25 }
  0x24   :  { %p372_p3 = scmp.lt.u32.totalorder %s368_s29, %s529_s2 }
  0x26   :  { %p374_p4 = pnand %p372_p3, %p369_p2 }
  0x28   :  { %377 = shalt.err (!%p374_p4)
}
  0x29   :  { %s378_s11 = scalar_lea.vmem %s42_s25, 512  ;;  %p383_p6 = scmp.lt.s32.totalorder %s42_s25, %s42_s25 }
  0x2a   :  { %p379_p5 = scmp.ne.s32.totalorder %s42_s25, %s378_s11  ;;  %p384_p7 = scmp.lt.s32.totalorder %s378_s11, %s378_s11 }
  0x2c   :  { %p385_p8 = por %p384_p7, %p383_p6 }
  0x2e   :  { %p386_p9 = pnand %p385_p8, %p379_p5 }
  0x30   :  { %389 = shalt.err (!%p386_p9)
}
  0x31   :  { %s421_s0 = smov 128   ;;  %s422_s27 = smov 8  }
  0x32   :  { %47 = dma.hbm_to_vmem [thread:$0]  %s529_s2, 512, %s42_s25, [#allocation6], %s421_s0, %s421_s0, %s422_s27  }
  0x33   :  { %s423_s14 = smov [#allocation8]   ;;  %s390_s18 = scalar_lea.hbm %s530_s3, 512 }
  0x34   :  { %s53_s15 = sshll.u32 %s423_s14, 4  ;;  %p391_p10 = scmp.ne.s32.totalorder %s530_s3, %s390_s18  ;;  %s54_s15 = int_to_ptr.vmem [resolvable:$true] %s53_s15 }
  0x35   :  { %p394_p11 = scmp.lt.u32.totalorder %s390_s18, %s530_s3 }
  0x37   :  { %p396_p12 = pnand %p394_p11, %p391_p10 }
  0x39   :  { %399 = shalt.err (!%p396_p12)
}
  0x3a   :  { %s400_s1 = scalar_lea.vmem %s54_s15, 512  ;;  %p405_p0 = scmp.lt.s32.totalorder %s54_s15, %s54_s15 }
  0x3b   :  { %p401_p13 = scmp.ne.s32.totalorder %s54_s15, %s400_s1  ;;  %p406_p1 = scmp.lt.s32.totalorder %s400_s1, %s400_s1 }
  0x3d   :  { %p407_p2 = por %p406_p1, %p405_p0 }
  0x3f   :  { %p408_p3 = pnand %p407_p2, %p401_p13 }
  0x41   :  { %411 = shalt.err (!%p408_p3)
}
  0x42   :  { %59 = dma.hbm_to_vmem [thread:$0]  %s530_s3, 512, %s54_s15, [#allocation9], %s421_s0, %s421_s0, %s422_s27  }
  0x43   :  { %412 = dma.done.wait [#allocation4], 128  }
  0x44   :  { %413 = vsyncadd [#allocation4], 4294967168 }
  0x45   :  { %414 = dma.done.wait [#allocation6], 640  }
  0x46   :  { %415 = vsyncadd [#allocation6], 4294966656 }
  0x47   :  { %416 = dma.done.wait [#allocation9], 512  }
  0x48   :  { %417 = vsyncadd [#allocation9], 4294966784  ;;  %v424_v0 = vmov 0.0|0.0   ;;  %vm425_vm0 = vmmov 0   ;;  %v426_v1 = vmov 0.0   ;;  %v84_v2 = vld [vmem:[#allocation8] sm:$0xff]  ;;  %v256_v27 = vstv %s533_s6 }
  0x49   :  { %303 = vmatprep.subr.bf16.mxu0 %v424_v0  ;;  %309 = vmatprep.subr.bf16.mxu1 %v424_v0  ;;  %v85_v3 = vld [vmem:[#allocation8 + $0x8] sm:$0xff]  ;;  %v79_v4 = vld [vmem:[#allocation7] sm:$0xff]  ;;  %v86_v7 = vld [vmem:[#allocation8 + $0x10] sm:$0xff]  ;;  %vm88_vm1 = vcmask 261120   ;;  %vm258_vm2 = vcmask 7168  }
  0x4a   :  { %289 = vmatprep.mubr.msk.f32.mxu0 %vm425_vm0, %v426_v1  ;;  %300 = vmatprep.mubr.msk.f32.mxu1 %vm425_vm0, %v426_v1  ;;  %v304_v5 = vpack.c.bf16 %v85_v3, %v84_v2  ;;  %v80_v6 = vld [vmem:[#allocation7 + $0x8] sm:$0xff]  ;;  %v87_v8 = vld [vmem:[#allocation8 + $0x18] sm:$0xff]  ;;  %v81_v10 = vld [vmem:[#allocation7 + $0x10] sm:$0xff] }
  0x4b   :  { %v310_v9 = vpack.c.bf16 %v80_v6, %v79_v4  ;;  %v82_v11 = vld [vmem:[#allocation7 + $0x18] sm:$0xff]  ;;  %v307_v12 = vpack.c.bf16 %v87_v8, %v86_v7  ;;  %v78_v15 = vld [vmem:[#allocation3] sm:$0xff] }
  0x4c   :  { %305 = vmatpush3.bf16.msra.mxu0 %v304_v5  ;;  %v313_v13 = vpack.c.bf16 %v82_v11, %v81_v10  ;;  %v83_v14 = vld [vmem:[#allocation5] sm:$0xff]  ;;  %v269_v18 = vld [vmem:[%s531_s4] ss:$0 sm:$0xff] }
  0x4d   :  { %311 = vmatpush3.bf16.msra.mxu1 %v310_v9  ;;  %306 = vmatprep.subr.bf16.mxu0 %v424_v0  ;;  %v270_v23 = vld [vmem:[%s532_s5] ss:$0 sm:$0xff] }
  0x4e   :  { %312 = vmatprep.subr.bf16.mxu1 %v424_v0 }
  0x50   :  { %308 = vmatpush3.bf16.msra.mxu0 %v307_v12 }
  0x51   :  { %314 = vmatpush3.bf16.msra.mxu1 %v313_v13 }
  0x53   :  { %290 = vmatmul.mubr.msk.f32.vlgmr.msra.gmra.mrb[0].mxu0 %vm88_vm1, %v83_v14 }
  0x54   :  { %301 = vmatmul.mubr.msk.f32.vlgmr.msra.gmra.mrb[0].mxu1 %vm88_vm1, %v78_v15 }
 0x126   :  { %v158_v16 = vpop.f32.mrb[0].mxu0 }
 0x127   :  { %v231_v17 = vpop.f32.mrb[0].mxu1  ;;  %v291_v19 = vpop.f32.mrb[1].mxu0 }
 0x128   :  { %v232_v20 = vadd.f32 %v231_v17, %v158_v16  ;;  %v302_v21 = vpop.f32.mrb[1].mxu1 }
 0x12a   :  { %v242_v22 = vadd.f32 %v269_v18, %v232_v20 }
 0x12c   :  { %v243_v24 = vmax.f32 %v242_v22, 0.0 }
 0x12e   :  { %v251_v25 = vmul.f32 %v270_v23, %v243_v24 }
 0x130   :  { %v252_v26 = vsel %vm88_vm1, %v251_v25, 0.0 }
 0x131   :  { %253 = vadd.xlane.f32.xlu0 %v252_v26 }
 0x1be   :  { %v254_v28 = vpop.xlane.xlu0 %253 }
 0x1bf   :  { %v257_v29 = vadd.f32 %v256_v27, %v254_v28 }
 0x1c1   :  { %259 = vst.msk [vmem:[%s534_s7] sm:$0xff] %vm258_vm2, %v257_v29 }
 0x1c2   :  { %264 = vsyncpa [#allocation4], 1 }
 0x1c3   :  { %265 = vsyncpa [#allocation6], 1 }
 0x1c4   :  { %266 = vsyncpa [#allocation9], 1 }

</bundles_post_ra>
